<compile_context>
chip_gen: v7x
topology: tpu7x:2x2x1
jax: 0.10.0
libtpu: 0.0.40
codegen_flags: <defaults>
</compile_context>

<pallas_src>
from functools import partial

import jax
import jax.numpy as jnp
from jax.experimental import pallas as pl
from jax.experimental.pallas import tpu as pltpu

BN_EPS = 1e-5
NUM_LAYERS = 5  # 4x (Linear + BN + ReLU) + final Linear (+ ReLU)


def _round_up(v, m):
    return (v + m - 1) // m * m


def _vmem_cap_bytes():
    try:
        cap = int(pltpu.get_tpu_info().vmem_capacity_bytes)
        if cap > 0:
            return cap
    except Exception:
        pass
    return 64 << 20  # conservative fallback (v7x-sized)


_VMEM_CAP = _vmem_cap_bytes()


# ----------------------------------------------------------------------------
# Kernel: whole batch resident in VMEM (BatchNorm needs the full-batch reduce).
# Inputs:
#   x_ref : (B, noise_dim) f32   (natural shape, no wrapper pad)
#   w_ref : (5, P, P)      bf16  (zero-padded weights, P = 128)
#   v_ref : (9, P)         f32   rows [g0,be0, g1,be1, g2,be2, g3,be3, b4]
# Output:
#   o_ref : (B, features_dim) f32
# ----------------------------------------------------------------------------
def generator_mlp_kernel(x_ref, w_ref, v_ref, o_ref, *, noise_dim, features_dim):
    batch = x_ref.shape[0]
    inv_b = jnp.float32(1.0 / batch)
    vecs = v_ref[...]  # (9, P) f32, loaded once

    def matmul(h, w):
        # bf16 operands, f32 accumulation on the MXU.
        return jnp.dot(h.astype(w_ref.dtype), w, preferred_element_type=jnp.float32)

    def bn_relu(h, layer):
        gamma = vecs[2 * layer:2 * layer + 1, :]
        beta = vecs[2 * layer + 1:2 * layer + 2, :]
        # Two-pass, numerically stable batch stats (biased var == torch train).
        mean = jnp.sum(h, axis=0, keepdims=True) * inv_b
        c = h - mean
        var = jnp.sum(c * c, axis=0, keepdims=True) * inv_b
        scale = gamma * jax.lax.rsqrt(var + BN_EPS)  # folded BN scale
        return jnp.maximum(c * scale + beta, 0.0)
        # Padded lanes: h == 0, mean == 0, var == 0, gamma == 0 -> stay 0.

    h = x_ref[...]                                            # (B, noise_dim) f32
    h = bn_relu(matmul(h, w_ref[0, :noise_dim, :]), 0)        # layer 0 (bias cancels)
    for i in range(1, NUM_LAYERS - 1):
        h = bn_relu(matmul(h, w_ref[i]), i)                   # layers 1..3
    h = matmul(h, w_ref[NUM_LAYERS - 1]) + vecs[2 * (NUM_LAYERS - 1):, :]  # final Linear
    o_ref[...] = jnp.maximum(h[:, :features_dim], 0.0)        # ReLU, narrow store


# ----------------------------------------------------------------------------
# Parameter construction / packing
# ----------------------------------------------------------------------------
def init_params(key, noise_dim, features_dim):
    """PyTorch-default-style init at the module's true (unpadded) shapes."""
    dims = [noise_dim, 32, 64, 128, 128, features_dim]
    params = []
    for i in range(NUM_LAYERS):
        fan_in, fan_out = dims[i], dims[i + 1]
        key, kw, kb = jax.random.split(key, 3)
        bound = 1.0 / jnp.sqrt(fan_in)
        w = jax.random.uniform(kw, (fan_in, fan_out), jnp.float32, -bound, bound)
        b = jax.random.uniform(kb, (1, fan_out), jnp.float32, -bound, bound)
        params.append((w, b))
    bn = [(jnp.ones((1, d), jnp.float32), jnp.zeros((1, d), jnp.float32))
          for d in dims[1:NUM_LAYERS]]
    return params, bn


def pack_params(params, bn, noise_dim):
    """Pack weights into one bf16 (5, P, P) slab and the per-feature vectors
    into one lane-dense f32 (9, P) slab: [g_i, beta_i] for i=0..3, then b_4.
    The Linear biases of the BN layers are intentionally omitted (they cancel
    in training-mode BatchNorm).  Padded rows/cols/lanes are exactly zero."""
    dims = [noise_dim] + [w.shape[1] for w, _ in params]
    pad = _round_up(max(dims), 128)

    w_stack = jnp.zeros((NUM_LAYERS, pad, pad), jnp.bfloat16)
    for i, (w, _) in enumerate(params):
        w_stack = w_stack.at[i, :w.shape[0], :w.shape[1]].set(
            w.astype(jnp.bfloat16))

    vec_slab = jnp.zeros((2 * (NUM_LAYERS - 1) + 1, pad), jnp.float32)
    for i in range(NUM_LAYERS - 1):
        g, be = bn[i]
        d = g.shape[-1]
        vec_slab = vec_slab.at[2 * i, :d].set(g.reshape(-1))
        vec_slab = vec_slab.at[2 * i + 1, :d].set(be.reshape(-1))
    b_last = params[-1][1]
    vec_slab = vec_slab.at[2 * (NUM_LAYERS - 1), :b_last.shape[-1]].set(
        b_last.reshape(-1))
    return w_stack, vec_slab


# ----------------------------------------------------------------------------
# Wrapper: no pad/slice ops, just the pallas_call.
# ----------------------------------------------------------------------------
@partial(jax.jit, static_argnames=("features_dim",))
def generator_mlp_forward(x, w_stack, vec_slab, features_dim):
    batch, noise_dim = x.shape
    pad = w_stack.shape[-1]

    bytes_accessed = int(batch * noise_dim * 4 + w_stack.size * 2
                         + vec_slab.size * 4 + batch * features_dim * 4)
    cost = pl.CostEstimate(
        flops=int(2 * batch * pad * pad * NUM_LAYERS + 12 * batch * pad),
        transcendentals=int((NUM_LAYERS - 1) * pad),  # rsqrt per BN layer
        bytes_accessed=bytes_accessed,
    )
    # I/O + params (double-buffered by the runtime) + live f32 activations.
    vmem_needed = 2 * bytes_accessed + 8 * batch * pad * 4 + (2 << 20)
    # Generation-aware cap: physical VMEM minus 8 MiB headroom for the compiler.
    vmem_limit = int(min(max(vmem_needed, 32 << 20), _VMEM_CAP - (8 << 20)))

    kernel = partial(generator_mlp_kernel,
                     noise_dim=int(noise_dim), features_dim=int(features_dim))
    vmem = pl.BlockSpec(memory_space=pltpu.MemorySpace.VMEM)
    return pl.pallas_call(
        kernel,
        out_shape=jax.ShapeDtypeStruct((batch, features_dim), jnp.float32),
        in_specs=[vmem, vmem, vmem],
        out_specs=vmem,
        compiler_params=pltpu.CompilerParams(vmem_limit_bytes=vmem_limit),
        cost_estimate=cost,
    )(x, w_stack, vec_slab)


# ----------------------------------------------------------------------------
# Pure-JAX reference mirroring the PyTorch module (with the Linear biases),
# same mixed precision (bf16 matmul operands, f32 accumulation), torch-style
# two-pass training-mode BatchNorm.
# ----------------------------------------------------------------------------
def generator_mlp_reference(x, params, bn):
    def mm(h, w):
        return jnp.dot(h.astype(jnp.bfloat16), w.astype(jnp.bfloat16),
                       preferred_element_type=jnp.float32)

    h = x.astype(jnp.float32)
    for i in range(NUM_LAYERS - 1):
        w, bias = params[i]
        g, beta = bn[i]
        h = mm(h, w) + bias
        mean = jnp.mean(h, axis=0, keepdims=True)
        var = jnp.mean((h - mean) ** 2, axis=0, keepdims=True)
        h = jnp.maximum((h - mean) * jax.lax.rsqrt(var + BN_EPS) * g + beta, 0.0)
    w, bias = params[-1]
    return jnp.maximum(mm(h, w) + bias, 0.0)


if __name__ == "__main__":
    noise_dim = 16
    features_dim = 64

    key = jax.random.PRNGKey(0)
    key, k_small, k_large = jax.random.split(key, 3)

    params, bn = init_params(key, noise_dim, features_dim)
    w_stack, vec_slab = pack_params(params, bn, noise_dim)

    for batch, kx in ((8, k_small), (256, k_large)):
        x = jax.random.normal(kx, (batch, noise_dim), jnp.float32)
        out = jax.block_until_ready(
            generator_mlp_forward(x, w_stack, vec_slab, features_dim))
        ref = generator_mlp_reference(x, params, bn)
        assert out.shape == (batch, features_dim)
        assert bool(jnp.all(jnp.isfinite(out)))
        assert jnp.allclose(out, ref, atol=2e-2, rtol=2e-2), \
            f"mismatch vs reference at batch={batch}"

    print("KERNEL_OK")
</pallas_src>

<mosaic_0001>
module attributes {stable_mosaic.version = 11 : i64} {
  func.func @generator_mlp_kernel(%arg0: memref<8x16xf32, #tpu.memory_space<vmem>>, %arg1: memref<5x128x128xbf16, #tpu.memory_space<vmem>>, %arg2: memref<9x128xf32, #tpu.memory_space<vmem>>, %arg3: memref<8x64xf32, #tpu.memory_space<vmem>>) attributes {dimension_semantics = [], scalar_prefetch = 0 : i64, scratch_operands = 0 : i64, tpu.core_type = #tpu.core_type<tc>} {
    %c0 = arith.constant 0 : index
    %c0_0 = arith.constant 0 : index
    %0 = vector.load %arg2[%c0, %c0_0] : memref<9x128xf32, #tpu.memory_space<vmem>>, vector<9x128xf32>
    %c0_1 = arith.constant 0 : index
    %c0_2 = arith.constant 0 : index
    %1 = vector.load %arg0[%c0_1, %c0_2] : memref<8x16xf32, #tpu.memory_space<vmem>>, vector<8x16xf32>
    %c0_3 = arith.constant 0 : index
    %c0_4 = arith.constant 0 : index
    %c0_5 = arith.constant 0 : index
    %2 = vector.load %arg1[%c0_3, %c0_4, %c0_5] : memref<5x128x128xbf16, #tpu.memory_space<vmem>>, vector<1x16x128xbf16>
    %3 = vector.shape_cast %2 : vector<1x16x128xbf16> to vector<16x128xbf16>
    %4 = arith.truncf %1 : vector<8x16xf32> to vector<8x16xbf16>
    %cst = arith.constant dense<0.000000e+00> : vector<8x128xf32>
    %5 = tpu.matmul %4, %3, %cst {dimension_numbers = #tpu.dot_dimension_numbers<[1], [0], [0], [1], [0, 0, 1, 1], [], []>} : vector<8x16xbf16>, vector<16x128xbf16>, vector<8x128xf32> -> vector<8x128xf32>
    %6 = vector.extract_strided_slice %0 {offsets = [0, 0], sizes = [1, 128], strides = [1, 1]} : vector<9x128xf32> to vector<1x128xf32>
    %7 = vector.extract_strided_slice %0 {offsets = [1, 0], sizes = [1, 128], strides = [1, 1]} : vector<9x128xf32> to vector<1x128xf32>
    %cst_6 = arith.constant dense<0.000000e+00> : vector<128xf32>
    %8 = vector.multi_reduction <add>, %5, %cst_6 [0] : vector<8x128xf32> to vector<128xf32>
    %9 = vector.shape_cast %8 : vector<128xf32> to vector<1x128xf32>
    %cst_7 = arith.constant 1.250000e-01 : f32
    %10 = vector.broadcast %cst_7 : f32 to vector<1x128xf32>
    %11 = arith.mulf %9, %10 : vector<1x128xf32>
    %12 = vector.broadcast %11 : vector<1x128xf32> to vector<8x128xf32>
    %13 = arith.subf %5, %12 : vector<8x128xf32>
    %14 = arith.mulf %13, %13 : vector<8x128xf32>
    %cst_8 = arith.constant dense<0.000000e+00> : vector<128xf32>
    %15 = vector.multi_reduction <add>, %14, %cst_8 [0] : vector<8x128xf32> to vector<128xf32>
    %16 = vector.shape_cast %15 : vector<128xf32> to vector<1x128xf32>
    %cst_9 = arith.constant 1.250000e-01 : f32
    %17 = vector.broadcast %cst_9 : f32 to vector<1x128xf32>
    %18 = arith.mulf %16, %17 : vector<1x128xf32>
    %cst_10 = arith.constant 9.99999974E-6 : f32
    %19 = vector.broadcast %cst_10 : f32 to vector<1x128xf32>
    %20 = arith.addf %18, %19 : vector<1x128xf32>
    %21 = math.rsqrt %20 : vector<1x128xf32>
    %22 = arith.mulf %6, %21 : vector<1x128xf32>
    %23 = vector.broadcast %22 : vector<1x128xf32> to vector<8x128xf32>
    %24 = arith.mulf %13, %23 : vector<8x128xf32>
    %25 = vector.broadcast %7 : vector<1x128xf32> to vector<8x128xf32>
    %26 = arith.addf %24, %25 : vector<8x128xf32>
    %cst_11 = arith.constant 0.000000e+00 : f32
    %27 = vector.broadcast %cst_11 : f32 to vector<8x128xf32>
    %28 = arith.maximumf %26, %27 : vector<8x128xf32>
    %c1 = arith.constant 1 : index
    %c0_12 = arith.constant 0 : index
    %c0_13 = arith.constant 0 : index
    %29 = vector.load %arg1[%c1, %c0_12, %c0_13] : memref<5x128x128xbf16, #tpu.memory_space<vmem>>, vector<1x128x128xbf16>
    %30 = vector.shape_cast %29 : vector<1x128x128xbf16> to vector<128x128xbf16>
    %31 = arith.truncf %28 : vector<8x128xf32> to vector<8x128xbf16>
    %cst_14 = arith.constant dense<0.000000e+00> : vector<8x128xf32>
    %32 = tpu.matmul %31, %30, %cst_14 {dimension_numbers = #tpu.dot_dimension_numbers<[1], [0], [0], [1], [0, 0, 1, 1], [], []>} : vector<8x128xbf16>, vector<128x128xbf16>, vector<8x128xf32> -> vector<8x128xf32>
    %33 = vector.extract_strided_slice %0 {offsets = [2, 0], sizes = [1, 128], strides = [1, 1]} : vector<9x128xf32> to vector<1x128xf32>
    %34 = vector.extract_strided_slice %0 {offsets = [3, 0], sizes = [1, 128], strides = [1, 1]} : vector<9x128xf32> to vector<1x128xf32>
    %cst_15 = arith.constant dense<0.000000e+00> : vector<128xf32>
    %35 = vector.multi_reduction <add>, %32, %cst_15 [0] : vector<8x128xf32> to vector<128xf32>
    %36 = vector.shape_cast %35 : vector<128xf32> to vector<1x128xf32>
    %cst_16 = arith.constant 1.250000e-01 : f32
    %37 = vector.broadcast %cst_16 : f32 to vector<1x128xf32>
    %38 = arith.mulf %36, %37 : vector<1x128xf32>
    %39 = vector.broadcast %38 : vector<1x128xf32> to vector<8x128xf32>
    %40 = arith.subf %32, %39 : vector<8x128xf32>
    %41 = arith.mulf %40, %40 : vector<8x128xf32>
    %cst_17 = arith.constant dense<0.000000e+00> : vector<128xf32>
    %42 = vector.multi_reduction <add>, %41, %cst_17 [0] : vector<8x128xf32> to vector<128xf32>
    %43 = vector.shape_cast %42 : vector<128xf32> to vector<1x128xf32>
    %cst_18 = arith.constant 1.250000e-01 : f32
    %44 = vector.broadcast %cst_18 : f32 to vector<1x128xf32>
    %45 = arith.mulf %43, %44 : vector<1x128xf32>
    %cst_19 = arith.constant 9.99999974E-6 : f32
    %46 = vector.broadcast %cst_19 : f32 to vector<1x128xf32>
    %47 = arith.addf %45, %46 : vector<1x128xf32>
    %48 = math.rsqrt %47 : vector<1x128xf32>
    %49 = arith.mulf %33, %48 : vector<1x128xf32>
    %50 = vector.broadcast %49 : vector<1x128xf32> to vector<8x128xf32>
    %51 = arith.mulf %40, %50 : vector<8x128xf32>
    %52 = vector.broadcast %34 : vector<1x128xf32> to vector<8x128xf32>
    %53 = arith.addf %51, %52 : vector<8x128xf32>
    %cst_20 = arith.constant 0.000000e+00 : f32
    %54 = vector.broadcast %cst_20 : f32 to vector<8x128xf32>
    %55 = arith.maximumf %53, %54 : vector<8x128xf32>
    %c2 = arith.constant 2 : index
    %c0_21 = arith.constant 0 : index
    %c0_22 = arith.constant 0 : index
    %56 = vector.load %arg1[%c2, %c0_21, %c0_22] : memref<5x128x128xbf16, #tpu.memory_space<vmem>>, vector<1x128x128xbf16>
    %57 = vector.shape_cast %56 : vector<1x128x128xbf16> to vector<128x128xbf16>
    %58 = arith.truncf %55 : vector<8x128xf32> to vector<8x128xbf16>
    %cst_23 = arith.constant dense<0.000000e+00> : vector<8x128xf32>
    %59 = tpu.matmul %58, %57, %cst_23 {dimension_numbers = #tpu.dot_dimension_numbers<[1], [0], [0], [1], [0, 0, 1, 1], [], []>} : vector<8x128xbf16>, vector<128x128xbf16>, vector<8x128xf32> -> vector<8x128xf32>
    %60 = vector.extract_strided_slice %0 {offsets = [4, 0], sizes = [1, 128], strides = [1, 1]} : vector<9x128xf32> to vector<1x128xf32>
    %61 = vector.extract_strided_slice %0 {offsets = [5, 0], sizes = [1, 128], strides = [1, 1]} : vector<9x128xf32> to vector<1x128xf32>
    %cst_24 = arith.constant dense<0.000000e+00> : vector<128xf32>
    %62 = vector.multi_reduction <add>, %59, %cst_24 [0] : vector<8x128xf32> to vector<128xf32>
    %63 = vector.shape_cast %62 : vector<128xf32> to vector<1x128xf32>
    %cst_25 = arith.constant 1.250000e-01 : f32
    %64 = vector.broadcast %cst_25 : f32 to vector<1x128xf32>
    %65 = arith.mulf %63, %64 : vector<1x128xf32>
    %66 = vector.broadcast %65 : vector<1x128xf32> to vector<8x128xf32>
    %67 = arith.subf %59, %66 : vector<8x128xf32>
    %68 = arith.mulf %67, %67 : vector<8x128xf32>
    %cst_26 = arith.constant dense<0.000000e+00> : vector<128xf32>
    %69 = vector.multi_reduction <add>, %68, %cst_26 [0] : vector<8x128xf32> to vector<128xf32>
    %70 = vector.shape_cast %69 : vector<128xf32> to vector<1x128xf32>
    %cst_27 = arith.constant 1.250000e-01 : f32
    %71 = vector.broadcast %cst_27 : f32 to vector<1x128xf32>
    %72 = arith.mulf %70, %71 : vector<1x128xf32>
    %cst_28 = arith.constant 9.99999974E-6 : f32
    %73 = vector.broadcast %cst_28 : f32 to vector<1x128xf32>
    %74 = arith.addf %72, %73 : vector<1x128xf32>
    %75 = math.rsqrt %74 : vector<1x128xf32>
    %76 = arith.mulf %60, %75 : vector<1x128xf32>
    %77 = vector.broadcast %76 : vector<1x128xf32> to vector<8x128xf32>
    %78 = arith.mulf %67, %77 : vector<8x128xf32>
    %79 = vector.broadcast %61 : vector<1x128xf32> to vector<8x128xf32>
    %80 = arith.addf %78, %79 : vector<8x128xf32>
    %cst_29 = arith.constant 0.000000e+00 : f32
    %81 = vector.broadcast %cst_29 : f32 to vector<8x128xf32>
    %82 = arith.maximumf %80, %81 : vector<8x128xf32>
    %c3 = arith.constant 3 : index
    %c0_30 = arith.constant 0 : index
    %c0_31 = arith.constant 0 : index
    %83 = vector.load %arg1[%c3, %c0_30, %c0_31] : memref<5x128x128xbf16, #tpu.memory_space<vmem>>, vector<1x128x128xbf16>
    %84 = vector.shape_cast %83 : vector<1x128x128xbf16> to vector<128x128xbf16>
    %85 = arith.truncf %82 : vector<8x128xf32> to vector<8x128xbf16>
    %cst_32 = arith.constant dense<0.000000e+00> : vector<8x128xf32>
    %86 = tpu.matmul %85, %84, %cst_32 {dimension_numbers = #tpu.dot_dimension_numbers<[1], [0], [0], [1], [0, 0, 1, 1], [], []>} : vector<8x128xbf16>, vector<128x128xbf16>, vector<8x128xf32> -> vector<8x128xf32>
    %87 = vector.extract_strided_slice %0 {offsets = [6, 0], sizes = [1, 128], strides = [1, 1]} : vector<9x128xf32> to vector<1x128xf32>
    %88 = vector.extract_strided_slice %0 {offsets = [7, 0], sizes = [1, 128], strides = [1, 1]} : vector<9x128xf32> to vector<1x128xf32>
    %cst_33 = arith.constant dense<0.000000e+00> : vector<128xf32>
    %89 = vector.multi_reduction <add>, %86, %cst_33 [0] : vector<8x128xf32> to vector<128xf32>
    %90 = vector.shape_cast %89 : vector<128xf32> to vector<1x128xf32>
    %cst_34 = arith.constant 1.250000e-01 : f32
    %91 = vector.broadcast %cst_34 : f32 to vector<1x128xf32>
    %92 = arith.mulf %90, %91 : vector<1x128xf32>
    %93 = vector.broadcast %92 : vector<1x128xf32> to vector<8x128xf32>
    %94 = arith.subf %86, %93 : vector<8x128xf32>
    %95 = arith.mulf %94, %94 : vector<8x128xf32>
    %cst_35 = arith.constant dense<0.000000e+00> : vector<128xf32>
    %96 = vector.multi_reduction <add>, %95, %cst_35 [0] : vector<8x128xf32> to vector<128xf32>
    %97 = vector.shape_cast %96 : vector<128xf32> to vector<1x128xf32>
    %cst_36 = arith.constant 1.250000e-01 : f32
    %98 = vector.broadcast %cst_36 : f32 to vector<1x128xf32>
    %99 = arith.mulf %97, %98 : vector<1x128xf32>
    %cst_37 = arith.constant 9.99999974E-6 : f32
    %100 = vector.broadcast %cst_37 : f32 to vector<1x128xf32>
    %101 = arith.addf %99, %100 : vector<1x128xf32>
    %102 = math.rsqrt %101 : vector<1x128xf32>
    %103 = arith.mulf %87, %102 : vector<1x128xf32>
    %104 = vector.broadcast %103 : vector<1x128xf32> to vector<8x128xf32>
    %105 = arith.mulf %94, %104 : vector<8x128xf32>
    %106 = vector.broadcast %88 : vector<1x128xf32> to vector<8x128xf32>
    %107 = arith.addf %105, %106 : vector<8x128xf32>
    %cst_38 = arith.constant 0.000000e+00 : f32
    %108 = vector.broadcast %cst_38 : f32 to vector<8x128xf32>
    %109 = arith.maximumf %107, %108 : vector<8x128xf32>
    %c4 = arith.constant 4 : index
    %c0_39 = arith.constant 0 : index
    %c0_40 = arith.constant 0 : index
    %110 = vector.load %arg1[%c4, %c0_39, %c0_40] : memref<5x128x128xbf16, #tpu.memory_space<vmem>>, vector<1x128x128xbf16>
    %111 = vector.shape_cast %110 : vector<1x128x128xbf16> to vector<128x128xbf16>
    %112 = arith.truncf %109 : vector<8x128xf32> to vector<8x128xbf16>
    %cst_41 = arith.constant dense<0.000000e+00> : vector<8x128xf32>
    %113 = tpu.matmul %112, %111, %cst_41 {dimension_numbers = #tpu.dot_dimension_numbers<[1], [0], [0], [1], [0, 0, 1, 1], [], []>} : vector<8x128xbf16>, vector<128x128xbf16>, vector<8x128xf32> -> vector<8x128xf32>
    %114 = vector.extract_strided_slice %0 {offsets = [8, 0], sizes = [1, 128], strides = [1, 1]} : vector<9x128xf32> to vector<1x128xf32>
    %115 = vector.broadcast %114 : vector<1x128xf32> to vector<8x128xf32>
    %116 = arith.addf %113, %115 : vector<8x128xf32>
    %117 = vector.extract_strided_slice %116 {offsets = [0, 0], sizes = [8, 64], strides = [1, 1]} : vector<8x128xf32> to vector<8x64xf32>
    %cst_42 = arith.constant 0.000000e+00 : f32
    %118 = vector.broadcast %cst_42 : f32 to vector<8x64xf32>
    %119 = arith.maximumf %117, %118 : vector<8x64xf32>
    %c0_43 = arith.constant 0 : index
    %c0_44 = arith.constant 0 : index
    %120 = vector.load %arg3[%c0_43, %c0_44] : memref<8x64xf32, #tpu.memory_space<vmem>>, vector<8x64xf32>
    tpu.vector_store %arg3[%c0_43, %c0_44], %119 {strides = array<i32>} : memref<8x64xf32, #tpu.memory_space<vmem>>, vector<8x64xf32>,
    return
  }
}

</mosaic_0001>

<bundles_post_ra>
// kernel: generator_mlp_forward.1
= control target key start
LH: loop header
LB: loop body
LE: loop exit
PB: predicated region body
PF: predicated region fallthrough
CT: control target
= control target key end

     0   :  { %8 = vsyncpa [#allocation3], 0  ;;  %s1123_s0 = inlined_call_operand.hbm [shape: f32[8,16], index: 0, kind: input, shape index: {}]   ;;  %s1124_s1 = inlined_call_operand.hbm [shape: bf16[5,128,128], index: 1, kind: input, shape index: {}]   ;;  %s1125_s2 = inlined_call_operand.hbm [shape: f32[9,128], index: 2, kind: input, shape index: {}]   ;;  %s1126_s3 = inlined_call_operand.hbm [shape: f32[8,64], index: 3, kind: output, shape index: {}]  }
   0x1   :  { %9 = vsyncpa [#allocation6], 0 }
   0x2   :  { %10 = vsyncpa [#allocation4], 0  ;;  %s982_s12 = smov [#allocation5]   ;;  %s888_s16 = scalar_lea.hbm %s1124_s1, 5120 }
   0x3   :  { %s26_s13 = sshll.u32 %s982_s12, 4  ;;  %p889_p0 = scmp.ne.s32.totalorder %s1124_s1, %s888_s16  ;;  %s27_s13 = int_to_ptr.vmem [resolvable:$true] %s26_s13 }
   0x4   :  { %p892_p1 = scmp.lt.u32.totalorder %s888_s16, %s1124_s1 }
   0x6   :  { %p894_p2 = pnand %p892_p1, %p889_p0 }
   0x8   :  { %897 = shalt.err (!%p894_p2)
}
   0x9   :  { %s898_s21 = scalar_lea.vmem %s27_s13, 5120  ;;  %p903_p4 = scmp.lt.s32.totalorder %s27_s13, %s27_s13 }
   0xa   :  { %p899_p3 = scmp.ne.s32.totalorder %s27_s13, %s898_s21  ;;  %p904_p5 = scmp.lt.s32.totalorder %s898_s21, %s898_s21 }
   0xc   :  { %p905_p6 = por %p904_p5, %p903_p4 }
   0xe   :  { %p906_p7 = pnand %p905_p6, %p899_p3 }
  0x10   :  { %909 = shalt.err (!%p906_p7)
}
  0x11   :  { %s983_s22 = smov 64   ;;  %s984_s23 = smov 4  }
  0x12   :  { %32 = dma.hbm_to_vmem [thread:$0]  %s1124_s1, 5120, %s27_s13, [#allocation6], %s983_s22, %s983_s22, %s984_s23  }
  0x13   :  { %s985_s26 = smov [#allocation2]   ;;  %s986_s28 = smov [#allocation7]  }
  0x14   :  { %s17_s27 = sshll.u32 %s985_s26, 4  ;;  %s38_s29 = sshll.u32 %s986_s28, 4  ;;  %s18_s27 = int_to_ptr.vmem [resolvable:$true] %s17_s27  ;;  %s39_s29 = int_to_ptr.vmem [resolvable:$true] %s38_s29 }
  0x15   :  { %s910_s5 = scalar_lea.hbm %s1123_s0, 128 }
  0x16   :  { %p911_p8 = scmp.ne.s32.totalorder %s1123_s0, %s910_s5  ;;  %p914_p9 = scmp.lt.u32.totalorder %s910_s5, %s1123_s0 }
  0x18   :  { %p916_p10 = pnand %p914_p9, %p911_p8 }
  0x1a   :  { %919 = shalt.err (!%p916_p10)
}
  0x1b   :  { %s920_s1 = scalar_lea.vmem %s18_s27, 128  ;;  %p925_p12 = scmp.lt.s32.totalorder %s18_s27, %s18_s27 }
  0x1c   :  { %p921_p11 = scmp.ne.s32.totalorder %s18_s27, %s920_s1  ;;  %p926_p13 = scmp.lt.s32.totalorder %s920_s1, %s920_s1 }
  0x1e   :  { %p927_p0 = por %p926_p13, %p925_p12 }
  0x20   :  { %p928_p1 = pnand %p927_p0, %p921_p11 }
  0x22   :  { %931 = shalt.err (!%p928_p1)
}
  0x23   :  { %20 = dma.hbm_to_vmem [thread:$0]  %s1123_s0, 128, %s18_s27, [#allocation3]  }
  0x24   :  { %s932_s14 = scalar_lea.hbm %s1125_s2, 256 }
  0x25   :  { %p933_p2 = scmp.ne.s32.totalorder %s1125_s2, %s932_s14  ;;  %p936_p3 = scmp.lt.u32.totalorder %s932_s14, %s1125_s2 }
  0x27   :  { %p938_p4 = pnand %p936_p3, %p933_p2 }
  0x29   :  { %941 = shalt.err (!%p938_p4)
}
  0x2a   :  { %s942_s19 = scalar_lea.vmem %s39_s29, 256  ;;  %p947_p6 = scmp.lt.s32.totalorder %s39_s29, %s39_s29 }
  0x2b   :  { %p943_p5 = scmp.ne.s32.totalorder %s39_s29, %s942_s19  ;;  %p948_p7 = scmp.lt.s32.totalorder %s942_s19, %s942_s19 }
  0x2d   :  { %p949_p8 = por %p948_p7, %p947_p6 }
  0x2f   :  { %p950_p9 = pnand %p949_p8, %p943_p5 }
  0x31   :  { %953 = shalt.err (!%p950_p9)
}
  0x32   :  { %s987_s0 = smov 128   ;;  %s988_s20 = smov 8  }
  0x33   :  { %44 = dma.hbm_to_vmem [thread:$0]  %s1125_s2, 256, %s39_s29, [#allocation6], %s987_s0, %s987_s0, %s988_s20  }
  0x34   :  { %976 = dma.done.wait [#allocation3], 128  }
  0x35   :  { %977 = vsyncadd [#allocation3], 4294967168 }
  0x36   :  { %978 = dma.done.wait [#allocation6], 5376  }
  0x37   :  { %979 = vsyncadd [#allocation6], 4294961920  ;;  %v989_v0 = vmov 0.0   ;;  %vm990_vm0 = vmmov 0   ;;  %v847_v1 = vld [vmem:[#allocation5] sm:$0xff]   ;;  %v57_v2 = vld [vmem:[#allocation2] sm:$0xff]  ;;  %v130_v33 = vlaneseq }
  0x38   :  { %751 = vmatprep.subr.bf16.mxu0 %v989_v0  ;;  %753 = vmatprep.mubr.msk.bf16.mxu0 %vm990_vm0, %v989_v0  ;;  %vm67_vm1 = vcmask 130048   ;;  %v60_v3 = vpack.c.bf16 %v57_v2, %v57_v2  ;;  %v848_v4 = vld [vmem:[#allocation5 + $0x40] sm:$0xff]   ;;  %v849_v5 = vld [vmem:[#allocation5 + $0x48] sm:$0xff]   ;;  %v850_v6 = vld [vmem:[#allocation5 + $0x50] sm:$0xff]   ;;  %s991_s2 = smov [#allocation8]   ;;  %vm660_vm2 = vcmask 523264  }
  0x39   :  { %757 = vmatprep.subr.bf16.mxu1 %v989_v0  ;;  %773 = vmatprep.mubr.msk.bf16.mxu1 %vm990_vm0, %v989_v0  ;;  %v851_v7 = vld [vmem:[#allocation5 + $0x58] sm:$0xff]   ;;  %v852_v8 = vld [vmem:[#allocation5 + $0x60] sm:$0xff]   ;;  %v853_v9 = vld [vmem:[#allocation5 + $0x68] sm:$0xff]   ;;  %v1065_v34 = vshrl.u32 %v130_v33, 7  ;;  %s668_s23 = sshll.u32 %s991_s2, 4  ;;  %s669_s23 = int_to_ptr.vmem [resolvable:$true] %s668_s23 }
  0x3a   :  { %752 = vmatpush3.bf16.msra.mxu0 %v847_v1  ;;  %758 = vmatpush3.bf16.msra.mxu1 %v848_v4  ;;  %v854_v10 = vld [vmem:[#allocation5 + $0x70] sm:$0xff]   ;;  %v855_v11 = vld [vmem:[#allocation5 + $0x78] sm:$0xff]   ;;  %v1067_v35 = vld [vmem:[#allocation7] sm:$0xff]  ;;  %s954_s24 = scalar_lea.vmem %s669_s23, 128  ;;  %p959_p11 = scmp.lt.s32.totalorder %s669_s23, %s669_s23 }
  0x3b   :  { %777 = vmatprep.subr.bf16.mxu0 %v989_v0  ;;  %759 = vmatprep.subr.bf16.mxu1 %v989_v0  ;;  %v132_v36 = vsub.s32 0, %v1065_v34  ;;  %v137_v37 = vsub.s32 1, %v1065_v34  ;;  %v856_v46 = vld [vmem:[#allocation5 + $0x80] sm:$0xff]   ;;  %v857_v47 = vld [vmem:[#allocation5 + $0x88] sm:$0xff]   ;;  %v858_v48 = vld [vmem:[#allocation5 + $0x90] sm:$0xff]   ;;  %p955_p10 = scmp.ne.s32.totalorder %s669_s23, %s954_s24  ;;  %p960_p12 = scmp.lt.s32.totalorder %s954_s24, %s954_s24 }
  0x3c   :  { %v859_v49 = vld [vmem:[#allocation5 + $0x98] sm:$0xff]   ;;  %v860_v50 = vld [vmem:[#allocation5 + $0xa0] sm:$0xff]   ;;  %v861_v51 = vld [vmem:[#allocation5 + $0xa8] sm:$0xff]  }
  0x3d   :  { %754 = vmatmul.mubr.msk.bf16.vlgmr.msra.gmra.mrb[0].mxu0 %vm67_vm1, %v60_v3  ;;  %v138_v41 = vrot.slane %v1067_v35, %v137_v37  ;;  %v862_v52 = vld [vmem:[#allocation5 + $0xb0] sm:$0xff]   ;;  %v863_v53 = vld [vmem:[#allocation5 + $0xb8] sm:$0xff]   ;;  %p961_p13 = por %p960_p12, %p959_p11 }
  0x3e   :  { %793 = vmatprep.mubr.msk.bf16.mxu0 %vm990_vm0, %v989_v0  ;;  %760 = vmatpush3.bf16.msra.mxu1 %v849_v5 }
  0x3f   :  { %761 = vmatprep.subr.bf16.mxu1 %v989_v0  ;;  %778 = vmatpush3.bf16.msra.mxu0 %v856_v46  ;;  %p962_p0 = pnand %p961_p13, %p955_p10 }
  0x40   :  { %779 = vmatprep.subr.bf16.mxu0 %v989_v0 }
  0x42   :  { %762 = vmatpush3.bf16.msra.mxu1 %v850_v6 }
  0x43   :  { %763 = vmatprep.subr.bf16.mxu1 %v989_v0  ;;  %780 = vmatpush3.bf16.msra.mxu0 %v857_v47 }
  0x44   :  { %781 = vmatprep.subr.bf16.mxu0 %v989_v0 }
  0x46   :  { %764 = vmatpush3.bf16.msra.mxu1 %v851_v7 }
  0x47   :  { %765 = vmatprep.subr.bf16.mxu1 %v989_v0  ;;  %782 = vmatpush3.bf16.msra.mxu0 %v858_v48 }
  0x48   :  { %783 = vmatprep.subr.bf16.mxu0 %v989_v0 }
  0x4a   :  { %766 = vmatpush3.bf16.msra.mxu1 %v852_v8 }
  0x4b   :  { %767 = vmatprep.subr.bf16.mxu1 %v989_v0  ;;  %784 = vmatpush3.bf16.msra.mxu0 %v859_v49 }
  0x4c   :  { %785 = vmatprep.subr.bf16.mxu0 %v989_v0 }
  0x4e   :  { %768 = vmatpush3.bf16.msra.mxu1 %v853_v9 }
  0x4f   :  { %769 = vmatprep.subr.bf16.mxu1 %v989_v0  ;;  %786 = vmatpush3.bf16.msra.mxu0 %v860_v50 }
  0x50   :  { %787 = vmatprep.subr.bf16.mxu0 %v989_v0 }
  0x52   :  { %770 = vmatpush3.bf16.msra.mxu1 %v854_v10 }
  0x53   :  { %771 = vmatprep.subr.bf16.mxu1 %v989_v0  ;;  %788 = vmatpush3.bf16.msra.mxu0 %v861_v51 }
  0x54   :  { %789 = vmatprep.subr.bf16.mxu0 %v989_v0 }
  0x56   :  { %772 = vmatpush3.bf16.msra.mxu1 %v855_v11 }
  0x57   :  { %797 = vmatprep.subr.bf16.mxu1 %v989_v0  ;;  %790 = vmatpush3.bf16.msra.mxu0 %v862_v52 }
  0x58   :  { %791 = vmatprep.subr.bf16.mxu0 %v989_v0 }
  0x5b   :  { %792 = vmatpush3.bf16.msra.mxu0 %v863_v53  ;;  %v404_v53 = vsub.s32 4, %v1065_v34 }
  0x5c   :  { %817 = vmatprep.subr.bf16.mxu0 %v989_v0 }
 0x110   :  { %v105_v12 = vpop.f32.mrb[0].mxu0 }
 0x111   :  { %v111_v13 = vrot.slane %v105_v12, 4  ;;  %v755_v14 = vpop.f32.mrb[1].mxu0 }
 0x112   :  { %v108_v15 = vpop.f32.mrb[2].mxu0 }
 0x113   :  { %v112_v16 = vadd.f32 %v111_v13, %v105_v12  ;;  %v756_v17 = vpop.f32.mrb[3].mxu0  ;;  %v273_v13 = vsub.s32 3, %v1065_v34 }
 0x115   :  { %v113_v18 = vrot.slane %v112_v16, 2  ;;  %v274_v17 = vrot.slane %v1067_v35, %v273_v13 }
 0x117   :  { %v114_v19 = vadd.f32 %v113_v18, %v112_v16 }
 0x119   :  { %v115_v20 = vrot.slane %v114_v19, 1 }
 0x11b   :  { %v116_v21 = vadd.f32 %v115_v20, %v114_v19 }
 0x11d   :  { %v117_v22 = vmul.f32 0.125, %v116_v21 }
 0x11f   :  { %v118_v23 = vsub.f32 %v105_v12, %v117_v22  ;;  %v268_v12 = vsub.s32 2, %v1065_v34  ;;  %v864_v22 = vld [vmem:[#allocation5 + $0xc0] sm:$0xff]  }
 0x121   :  { %v119_v24 = vmul.f32 %v118_v23, %v118_v23 }
 0x123   :  { %v120_v25 = vrot.slane %v119_v24, 4 }
 0x125   :  { %v121_v26 = vadd.f32 %v120_v25, %v119_v24  ;;  %v866_v24 = vld [vmem:[#allocation5 + $0xd0] sm:$0xff]   ;;  %v867_v25 = vld [vmem:[#allocation5 + $0xd8] sm:$0xff]  }
 0x127   :  { %v122_v27 = vrot.slane %v121_v26, 2 }
 0x129   :  { %v123_v28 = vadd.f32 %v122_v27, %v121_v26  ;;  %v868_v26 = vld [vmem:[#allocation5 + $0xe0] sm:$0xff]   ;;  %v869_v27 = vld [vmem:[#allocation5 + $0xe8] sm:$0xff]  }
 0x12b   :  { %v124_v29 = vrot.slane %v123_v28, 1 }
 0x12d   :  { %v125_v30 = vadd.f32 %v124_v29, %v123_v28  ;;  %v870_v28 = vld [vmem:[#allocation5 + $0xf0] sm:$0xff]   ;;  %v871_v29 = vld [vmem:[#allocation5 + $0xf8] sm:$0xff]  }
 0x12f   :  { %v126_v31 = vmul.f32 0.125, %v125_v30 }
 0x131   :  { %v127_v32 = vadd.f32 1e-05, %v126_v31 }
 0x133   :  { %880 = vrsqrt.f32 %v127_v32 }
 0x13d   :  { %v881_v38 = vpop.eup %880 }
 0x13e   :  { %v129_v39 = vmul.f32 %v881_v38, %v1067_v35 }
 0x140   :  { %v133_v40 = vrot.slane %v129_v39, %v132_v36 }
 0x142   :  { %v134_v42 = vmul.f32 %v133_v40, %v118_v23  ;;  %v865_v23 = vld [vmem:[#allocation5 + $0xc8] sm:$0xff]  }
 0x144   :  { %v139_v43 = vadd.f32 %v138_v41, %v134_v42 }
 0x146   :  { %v140_v44 = vmax.f32 %v139_v43, 0.0 }
 0x148   :  { %v158_v45 = vpack.c.bf16 %v140_v44, %v140_v44 }
 0x14a   :  { %774 = vmatmul.mubr.bf16.vlgmr.msra.gmra.mrb[0].mxu1 %v158_v45 }
 0x14b   :  { %813 = vmatprep.mubr.msk.bf16.mxu1 %vm990_vm0, %v989_v0  ;;  %798 = vmatpush3.bf16.msra.mxu1 %v864_v22 }
 0x14c   :  { %799 = vmatprep.subr.bf16.mxu1 %v989_v0 }
 0x14f   :  { %800 = vmatpush3.bf16.msra.mxu1 %v865_v23 }
 0x150   :  { %801 = vmatprep.subr.bf16.mxu1 %v989_v0 }
 0x153   :  { %802 = vmatpush3.bf16.msra.mxu1 %v866_v24 }
 0x154   :  { %803 = vmatprep.subr.bf16.mxu1 %v989_v0 }
 0x157   :  { %804 = vmatpush3.bf16.msra.mxu1 %v867_v25 }
 0x158   :  { %805 = vmatprep.subr.bf16.mxu1 %v989_v0 }
 0x15b   :  { %806 = vmatpush3.bf16.msra.mxu1 %v868_v26 }
 0x15c   :  { %807 = vmatprep.subr.bf16.mxu1 %v989_v0 }
 0x15f   :  { %808 = vmatpush3.bf16.msra.mxu1 %v869_v27 }
 0x160   :  { %809 = vmatprep.subr.bf16.mxu1 %v989_v0 }
 0x163   :  { %810 = vmatpush3.bf16.msra.mxu1 %v870_v28  ;;  %v540_v28 = vsub.s32 6, %v1065_v34 }
 0x164   :  { %811 = vmatprep.subr.bf16.mxu1 %v989_v0 }
 0x167   :  { %812 = vmatpush3.bf16.msra.mxu1 %v871_v29  ;;  %v545_v29 = vsub.s32 7, %v1065_v34 }
 0x21d   :  { %v241_v54 = vpop.f32.mrb[0].mxu1 }
 0x21e   :  { %v247_v55 = vrot.slane %v241_v54, 4  ;;  %v775_v56 = vpop.f32.mrb[1].mxu1 }
 0x21f   :  { %v244_v57 = vpop.f32.mrb[2].mxu1 }
 0x220   :  { %v248_v58 = vadd.f32 %v247_v55, %v241_v54  ;;  %v776_v59 = vpop.f32.mrb[3].mxu1 }
 0x222   :  { %v249_v60 = vrot.slane %v248_v58, 2 }
 0x224   :  { %v250_v61 = vadd.f32 %v249_v60, %v248_v58 }
 0x226   :  { %v251_v62 = vrot.slane %v250_v61, 1 }
 0x228   :  { %v252_v63 = vadd.f32 %v251_v62, %v250_v61 }
 0x22a   :  { %v253_v1 = vmul.f32 0.125, %v252_v63  ;;  %v872_v63 = vld [vmem:[#allocation5 + $0x100] sm:$0xff]  }
 0x22c   :  { %v254_v2 = vsub.f32 %v241_v54, %v253_v1  ;;  %v409_v54 = vsub.s32 5, %v1065_v34  ;;  %v873_v1 = vld [vmem:[#allocation5 + $0x108] sm:$0xff]  }
 0x22e   :  { %v255_v3 = vmul.f32 %v254_v2, %v254_v2  ;;  %v410_v58 = vrot.slane %v1067_v35, %v409_v54 }
 0x230   :  { %v256_v4 = vrot.slane %v255_v3, 4 }
 0x232   :  { %v257_v5 = vadd.f32 %v256_v4, %v255_v3  ;;  %v875_v3 = vld [vmem:[#allocation5 + $0x118] sm:$0xff]   ;;  %v876_v4 = vld [vmem:[#allocation5 + $0x120] sm:$0xff]  }
 0x234   :  { %v258_v6 = vrot.slane %v257_v5, 2 }
 0x236   :  { %v259_v7 = vadd.f32 %v258_v6, %v257_v5  ;;  %v877_v5 = vld [vmem:[#allocation5 + $0x128] sm:$0xff]   ;;  %v878_v6 = vld [vmem:[#allocation5 + $0x130] sm:$0xff]  }
 0x238   :  { %v260_v8 = vrot.slane %v259_v7, 1 }
 0x23a   :  { %v261_v9 = vadd.f32 %v260_v8, %v259_v7  ;;  %v879_v7 = vld [vmem:[#allocation5 + $0x138] sm:$0xff]  }
 0x23c   :  { %v262_v10 = vmul.f32 0.125, %v261_v9 }
 0x23e   :  { %v263_v11 = vadd.f32 1e-05, %v262_v10 }
 0x240   :  { %882 = vrsqrt.f32 %v263_v11 }
 0x24a   :  { %v883_v14 = vpop.eup %882 }
 0x24b   :  { %v265_v15 = vmul.f32 %v883_v14, %v1067_v35 }
 0x24d   :  { %v269_v16 = vrot.slane %v265_v15, %v268_v12 }
 0x24f   :  { %v270_v18 = vmul.f32 %v269_v16, %v254_v2  ;;  %v874_v2 = vld [vmem:[#allocation5 + $0x110] sm:$0xff]  }
 0x251   :  { %v275_v19 = vadd.f32 %v274_v17, %v270_v18 }
 0x253   :  { %v276_v20 = vmax.f32 %v275_v19, 0.0 }
 0x255   :  { %v294_v21 = vpack.c.bf16 %v276_v20, %v276_v20 }
 0x257   :  { %794 = vmatmul.mubr.bf16.vlgmr.msra.gmra.mrb[4].mxu0 %v294_v21 }
 0x258   :  { %833 = vmatprep.mubr.msk.bf16.mxu0 %vm990_vm0, %v989_v0  ;;  %818 = vmatpush3.bf16.msra.mxu0 %v872_v63 }
 0x259   :  { %819 = vmatprep.subr.bf16.mxu0 %v989_v0 }
 0x25c   :  { %820 = vmatpush3.bf16.msra.mxu0 %v873_v1 }
 0x25d   :  { %821 = vmatprep.subr.bf16.mxu0 %v989_v0 }
 0x260   :  { %822 = vmatpush3.bf16.msra.mxu0 %v874_v2 }
 0x261   :  { %823 = vmatprep.subr.bf16.mxu0 %v989_v0 }
 0x264   :  { %824 = vmatpush3.bf16.msra.mxu0 %v875_v3 }
 0x265   :  { %825 = vmatprep.subr.bf16.mxu0 %v989_v0 }
 0x268   :  { %826 = vmatpush3.bf16.msra.mxu0 %v876_v4 }
 0x269   :  { %827 = vmatprep.subr.bf16.mxu0 %v989_v0 }
 0x26c   :  { %828 = vmatpush3.bf16.msra.mxu0 %v877_v5 }
 0x26d   :  { %829 = vmatprep.subr.bf16.mxu0 %v989_v0 }
 0x270   :  { %830 = vmatpush3.bf16.msra.mxu0 %v878_v6 }
 0x271   :  { %831 = vmatprep.subr.bf16.mxu0 %v989_v0 }
 0x274   :  { %832 = vmatpush3.bf16.msra.mxu0 %v879_v7 }
 0x32a   :  { %v377_v30 = vpop.f32.mrb[4].mxu0 }
 0x32b   :  { %v383_v31 = vrot.slane %v377_v30, 4  ;;  %v795_v32 = vpop.f32.mrb[5].mxu0 }
 0x32c   :  { %v380_v33 = vpop.f32.mrb[6].mxu0 }
 0x32d   :  { %v384_v36 = vadd.f32 %v383_v31, %v377_v30  ;;  %v796_v37 = vpop.f32.mrb[7].mxu0  ;;  %v546_v33 = vrot.slane %v1067_v35, %v545_v29 }
 0x32f   :  { %v385_v38 = vrot.slane %v384_v36, 2 }
 0x331   :  { %v386_v39 = vadd.f32 %v385_v38, %v384_v36 }
 0x333   :  { %v387_v40 = vrot.slane %v386_v39, 1 }
 0x335   :  { %v388_v41 = vadd.f32 %v387_v40, %v386_v39  ;;  %v704_v40 = vld [vmem:[#allocation7 + $0x8] ss:$0 sm:$0xff] }
 0x337   :  { %v389_v42 = vmul.f32 0.125, %v388_v41 }
 0x339   :  { %v390_v43 = vsub.f32 %v377_v30, %v389_v42 }
 0x33b   :  { %v391_v44 = vmul.f32 %v390_v43, %v390_v43 }
 0x33d   :  { %v392_v45 = vrot.slane %v391_v44, 4 }
 0x33f   :  { %v393_v46 = vadd.f32 %v392_v45, %v391_v44 }
 0x341   :  { %v394_v47 = vrot.slane %v393_v46, 2 }
 0x343   :  { %v395_v48 = vadd.f32 %v394_v47, %v393_v46 }
 0x345   :  { %v396_v49 = vrot.slane %v395_v48, 1 }
 0x347   :  { %v397_v50 = vadd.f32 %v396_v49, %v395_v48 }
 0x349   :  { %v398_v51 = vmul.f32 0.125, %v397_v50 }
 0x34b   :  { %v399_v52 = vadd.f32 1e-05, %v398_v51 }
 0x34d   :  { %884 = vrsqrt.f32 %v399_v52 }
 0x357   :  { %v885_v55 = vpop.eup %884 }
 0x358   :  { %v401_v56 = vmul.f32 %v885_v55, %v1067_v35 }
 0x35a   :  { %v405_v57 = vrot.slane %v401_v56, %v404_v53 }
 0x35c   :  { %v406_v59 = vmul.f32 %v405_v57, %v390_v43 }
 0x35e   :  { %v411_v60 = vadd.f32 %v410_v58, %v406_v59 }
 0x360   :  { %v412_v61 = vmax.f32 %v411_v60, 0.0 }
 0x362   :  { %v430_v62 = vpack.c.bf16 %v412_v61, %v412_v61 }
 0x364   :  { %814 = vmatmul.mubr.bf16.vlgmr.msra.gmra.mrb[4].mxu1 %v430_v62 }
 0x437   :  { %v513_v8 = vpop.f32.mrb[4].mxu1 }
 0x438   :  { %v519_v9 = vrot.slane %v513_v8, 4  ;;  %v815_v10 = vpop.f32.mrb[5].mxu1 }
 0x439   :  { %v516_v11 = vpop.f32.mrb[6].mxu1 }
 0x43a   :  { %v520_v12 = vadd.f32 %v519_v9, %v513_v8  ;;  %v816_v13 = vpop.f32.mrb[7].mxu1 }
 0x43c   :  { %v521_v14 = vrot.slane %v520_v12, 2 }
 0x43e   :  { %v522_v15 = vadd.f32 %v521_v14, %v520_v12 }
 0x440   :  { %v523_v16 = vrot.slane %v522_v15, 1 }
 0x442   :  { %v524_v17 = vadd.f32 %v523_v16, %v522_v15 }
 0x444   :  { %v525_v18 = vmul.f32 0.125, %v524_v17 }
 0x446   :  { %v526_v19 = vsub.f32 %v513_v8, %v525_v18 }
 0x448   :  { %v527_v20 = vmul.f32 %v526_v19, %v526_v19 }
 0x44a   :  { %v528_v21 = vrot.slane %v527_v20, 4 }
 0x44c   :  { %v529_v22 = vadd.f32 %v528_v21, %v527_v20 }
 0x44e   :  { %v530_v23 = vrot.slane %v529_v22, 2 }
 0x450   :  { %v531_v24 = vadd.f32 %v530_v23, %v529_v22 }
 0x452   :  { %v532_v0 = vrot.slane %v531_v24, 1 }
 0x454   :  { %v533_v25 = vadd.f32 %v532_v0, %v531_v24 }
 0x456   :  { %v534_v26 = vmul.f32 0.125, %v533_v25 }
 0x458   :  { %v535_v27 = vadd.f32 1e-05, %v534_v26 }
 0x45a   :  { %886 = vrsqrt.f32 %v535_v27 }
 0x464   :  { %v887_v30 = vpop.eup %886 }
 0x465   :  { %v537_v31 = vmul.f32 %v887_v30, %v1067_v35 }
 0x467   :  { %v541_v32 = vrot.slane %v537_v31, %v540_v28 }
 0x469   :  { %v542_v36 = vmul.f32 %v541_v32, %v526_v19 }
 0x46b   :  { %v547_v37 = vadd.f32 %v546_v33, %v542_v36 }
 0x46d   :  { %v548_v38 = vmax.f32 %v547_v37, 0.0 }
 0x46f   :  { %v566_v39 = vpack.c.bf16 %v548_v38, %v548_v38 }
 0x471   :  { %834 = vmatmul.mubr.bf16.vlgmr.msra.gmra.mrb[8].mxu0 %v566_v39 }
 0x544   :  { %v653_v41 = vpop.f32.mrb[8].mxu0 }
 0x545   :  { %v654_v42 = vadd.f32 %v704_v40, %v653_v41  ;;  %v835_v43 = vpop.f32.mrb[9].mxu0 }
 0x546   :  { %v656_v44 = vpop.f32.mrb[10].mxu0 }
 0x547   :  { %v659_v34 = vmax.f32 %v654_v42, 0.0  ;;  %v836_v45 = vpop.f32.mrb[11].mxu0 }
 0x549   :  { %661 = vst.msk [vmem:[#allocation8] sm:$0xff] %vm660_vm2, %v659_v34 }
 0x54a   :  { %965 = shalt.err (!%p962_p0)
}
 0x54b   :  { %s966_s27 = scalar_lea.hbm %s1126_s3, 128 }
 0x54c   :  { %p967_p1 = scmp.ne.s32.totalorder %s1126_s3, %s966_s27  ;;  %p970_p2 = scmp.lt.u32.totalorder %s966_s27, %s1126_s3 }
 0x54e   :  { %p972_p3 = pnand %p970_p2, %p967_p1 }
 0x550   :  { %975 = shalt.err (!%p972_p3)
}
 0x551   :  { %671 = dma.vmem_to_hbm [thread:$0]  %s669_s23, 128, %s1126_s3, [#allocation4]  }
 0x552   :  { %980 = dma.done.wait [#allocation4], 128  }
 0x553   :  { %981 = vsyncadd [#allocation4], 4294967168 }
 0x554   :  { %675 = vsyncpa [#allocation3], 1 }
 0x555   :  { %676 = vsyncpa [#allocation6], 1 }
 0x556   :  { %677 = vsyncpa [#allocation4], 1 }

</bundles_post_ra>
